<compile_context>
chip_gen: v7x
topology: tpu7x:2x2x1
jax: 0.10.0
libtpu: 0.0.40
codegen_flags: <defaults>
</compile_context>

<pallas_src>
import math
from functools import partial

import jax
import jax.numpy as jnp
from jax.experimental import pallas as pl
from jax.experimental.pallas import tpu as pltpu


def _block(dim, target):
    """Tile size: `target` if it evenly divides `dim`, else the full dim."""
    return target if dim % target == 0 else dim


# ----------------------------------------------------------------------------
# 1) Tiled linear (used for the fused QKV projection)
# ----------------------------------------------------------------------------
def _matmul_bias_kernel(x_ref, w_ref, b_ref, o_ref, acc_ref):
    @pl.when(pl.program_id(2) == 0)
    def _():
        acc_ref[...] = jnp.zeros_like(acc_ref)

    acc_ref[...] += jnp.dot(x_ref[...], w_ref[...],
                            preferred_element_type=jnp.float32)

    @pl.when(pl.program_id(2) == pl.num_programs(2) - 1)
    def _():
        o_ref[...] = (acc_ref[...] + b_ref[...]).astype(o_ref.dtype)


def linear(x, w, b, *, tm=256, tn=256, tk=512):
    """x: (M, K), w: (K, N), b: (N,) -> (M, N).  Tiled, K-reduction accumulator."""
    M, K = x.shape
    _, N = w.shape
    bm, bn, bk = _block(M, tm), _block(N, tn), _block(K, tk)
    return pl.pallas_call(
        _matmul_bias_kernel,
        out_shape=jax.ShapeDtypeStruct((M, N), x.dtype),
        grid_spec=pltpu.PrefetchScalarGridSpec(
            num_scalar_prefetch=0,
            grid=(M // bm, N // bn, K // bk),
            in_specs=[
                pl.BlockSpec((bm, bk), lambda i, j, k: (i, k)),
                pl.BlockSpec((bk, bn), lambda i, j, k: (k, j)),
                pl.BlockSpec((1, bn), lambda i, j, k: (0, j)),
            ],
            out_specs=pl.BlockSpec((bm, bn), lambda i, j, k: (i, j)),
            scratch_shapes=[pltpu.VMEM((bm, bn), jnp.float32)],
        ),
        compiler_params=pltpu.CompilerParams(
            dimension_semantics=("parallel", "parallel", "arbitrary")),
    )(x, w, b.reshape(1, N))


# ----------------------------------------------------------------------------
# 2) Multi-head self-attention: one batch element per grid step, all heads
#    per step, lane-dense (T, H*dk) output, mask computed from a (1, T) row.
# ----------------------------------------------------------------------------
def _mha_attention_kernel(qkv_ref, m_ref, o_ref, *, n_heads, d_k, scale):
    """qkv_ref: (T, 3*H*dk) fused [Q | K | V] rows, m_ref: (1, T), o_ref: (T, H*dk)."""
    dh = n_heads * d_k
    neg = jnp.float32(-1e30)
    mask = m_ref[...] > 0                       # (1, T) key mask, broadcasts over queries
    # TODO(synk): for long sequences convert to flash-style online softmax with a
    # KV grid axis; full-T scores are fine at these block sizes.
    for h in range(n_heads):                    # static unroll over heads
        q = qkv_ref[:, h * d_k:(h + 1) * d_k].astype(jnp.float32)
        k = qkv_ref[:, dh + h * d_k:dh + (h + 1) * d_k].astype(jnp.float32)
        v = qkv_ref[:, 2 * dh + h * d_k:2 * dh + (h + 1) * d_k].astype(jnp.float32)
        s = jnp.dot(q, k.T, preferred_element_type=jnp.float32) * scale
        s = jnp.where(mask, s, neg)
        s = s - jnp.max(s, axis=-1, keepdims=True)
        p = jnp.exp(s)
        p = p * pl.reciprocal(jnp.sum(p, axis=-1, keepdims=True), approx=True)
        o = jnp.dot(p, v, preferred_element_type=jnp.float32)
        o_ref[:, h * d_k:(h + 1) * d_k] = o.astype(o_ref.dtype)


def attention(qkv, pad_mask, *, n_heads, d_k):
    """qkv: (N, T, 3*H*dk) fused projection; pad_mask: (N, T) bool or None."""
    N, T, _ = qkv.shape
    dh = n_heads * d_k
    if pad_mask is None:
        mask = jnp.ones((N, 1, T), jnp.float32)
    else:
        mask = pad_mask.astype(jnp.float32).reshape(N, 1, T)
    return pl.pallas_call(
        partial(_mha_attention_kernel, n_heads=n_heads, d_k=d_k,
                scale=1.0 / math.sqrt(d_k)),
        out_shape=jax.ShapeDtypeStruct((N, T, dh), qkv.dtype),
        grid=(N,),
        in_specs=[
            pl.BlockSpec((None, T, 3 * dh), lambda n: (n, 0, 0)),
            pl.BlockSpec((None, 1, T), lambda n: (n, 0, 0)),
        ],
        out_specs=pl.BlockSpec((None, T, dh), lambda n: (n, 0, 0)),
        compiler_params=pltpu.CompilerParams(
            dimension_semantics=("parallel",)),
    )(qkv, mask)


# ----------------------------------------------------------------------------
# 3) Output projection + residual + LayerNorm (fused, K-tiled reduction)
# ----------------------------------------------------------------------------
def _proj_add_ln_kernel(a_ref, w_ref, b_ref, res_ref, g_ref, bt_ref, o_ref,
                        acc_ref, *, eps):
    k = pl.program_id(1)

    @pl.when(k == 0)
    def _():
        acc_ref[...] = jnp.zeros_like(acc_ref)

    acc_ref[...] += jnp.dot(a_ref[...], w_ref[...],
                            preferred_element_type=jnp.float32)

    @pl.when(k == pl.num_programs(1) - 1)
    def _():
        y = acc_ref[...] + b_ref[...] + res_ref[...].astype(jnp.float32)
        mu = jnp.mean(y, axis=-1, keepdims=True)
        var = jnp.mean((y - mu) ** 2, axis=-1, keepdims=True)
        yn = (y - mu) * jax.lax.rsqrt(var + eps)
        o_ref[...] = (yn * g_ref[...] + bt_ref[...]).astype(o_ref.dtype)


def proj_add_layernorm(a, w, b, residual, gamma, beta, *, eps=1e-5,
                       tm=256, tk=512):
    """LayerNorm(residual + a @ w + b).  a: (M, K), w: (K, D), residual: (M, D)."""
    M, K = a.shape
    _, D = w.shape
    bm, bk = _block(M, tm), _block(K, tk)
    return pl.pallas_call(
        partial(_proj_add_ln_kernel, eps=eps),
        out_shape=jax.ShapeDtypeStruct((M, D), a.dtype),
        grid_spec=pltpu.PrefetchScalarGridSpec(
            num_scalar_prefetch=0,
            grid=(M // bm, K // bk),
            in_specs=[
                pl.BlockSpec((bm, bk), lambda i, k: (i, k)),
                pl.BlockSpec((bk, D), lambda i, k: (k, 0)),
                pl.BlockSpec((1, D), lambda i, k: (0, 0)),
                pl.BlockSpec((bm, D), lambda i, k: (i, 0)),
                pl.BlockSpec((1, D), lambda i, k: (0, 0)),
                pl.BlockSpec((1, D), lambda i, k: (0, 0)),
            ],
            out_specs=pl.BlockSpec((bm, D), lambda i, k: (i, 0)),
            scratch_shapes=[pltpu.VMEM((bm, D), jnp.float32)],
        ),
        compiler_params=pltpu.CompilerParams(
            dimension_semantics=("parallel", "arbitrary")),
    )(a, w, b.reshape(1, D), residual, gamma.reshape(1, D), beta.reshape(1, D))


# ----------------------------------------------------------------------------
# 4) FFN (Linear -> GELU -> Linear) + residual + LayerNorm (fused; the 4*D
#    hidden activation stays in VMEM, tiled as the reduction axis)
# ----------------------------------------------------------------------------
def _ffn_add_ln_kernel(x_ref, w1_ref, b1_ref, w2_ref, b2_ref, g_ref, bt_ref,
                       o_ref, acc_ref, *, eps):
    j = pl.program_id(1)

    @pl.when(j == 0)
    def _():
        acc_ref[...] = jnp.zeros_like(acc_ref)

    x = x_ref[...].astype(jnp.float32)
    h = jnp.dot(x, w1_ref[...], preferred_element_type=jnp.float32) + b1_ref[...]
    h = 0.5 * h * (1.0 + jax.lax.erf(h * (1.0 / math.sqrt(2.0))))   # exact GELU
    acc_ref[...] += jnp.dot(h, w2_ref[...], preferred_element_type=jnp.float32)

    @pl.when(j == pl.num_programs(1) - 1)
    def _():
        y = acc_ref[...] + b2_ref[...] + x        # residual
        mu = jnp.mean(y, axis=-1, keepdims=True)
        var = jnp.mean((y - mu) ** 2, axis=-1, keepdims=True)
        yn = (y - mu) * jax.lax.rsqrt(var + eps)
        o_ref[...] = (yn * g_ref[...] + bt_ref[...]).astype(o_ref.dtype)


def ffn_add_layernorm(x, w1, b1, w2, b2, gamma, beta, *, eps=1e-5,
                      tm=256, th=512):
    """LayerNorm(x + GELU(x @ w1 + b1) @ w2 + b2).  x: (M, D)."""
    M, D = x.shape
    _, H = w1.shape
    bm, bh = _block(M, tm), _block(H, th)
    return pl.pallas_call(
        partial(_ffn_add_ln_kernel, eps=eps),
        out_shape=jax.ShapeDtypeStruct((M, D), x.dtype),
        grid_spec=pltpu.PrefetchScalarGridSpec(
            num_scalar_prefetch=0,
            grid=(M // bm, H // bh),
            in_specs=[
                pl.BlockSpec((bm, D), lambda i, j: (i, 0)),
                pl.BlockSpec((D, bh), lambda i, j: (0, j)),
                pl.BlockSpec((1, bh), lambda i, j: (0, j)),
                pl.BlockSpec((bh, D), lambda i, j: (j, 0)),
                pl.BlockSpec((1, D), lambda i, j: (0, 0)),
                pl.BlockSpec((1, D), lambda i, j: (0, 0)),
                pl.BlockSpec((1, D), lambda i, j: (0, 0)),
            ],
            out_specs=pl.BlockSpec((bm, D), lambda i, j: (i, 0)),
            scratch_shapes=[pltpu.VMEM((bm, D), jnp.float32)],
        ),
        compiler_params=pltpu.CompilerParams(
            dimension_semantics=("parallel", "arbitrary")),
    )(x, w1, b1.reshape(1, H), w2, b2.reshape(1, D),
      gamma.reshape(1, D), beta.reshape(1, D))


# ----------------------------------------------------------------------------
# EncoderBlock forward
# ----------------------------------------------------------------------------
def encoder_block(params, x, pad_mask=None, *, n_heads, d_k):
    N, T, D = x.shape
    dh = n_heads * d_k
    x2 = x.reshape(N * T, D)

    # fused Q/K/V projection (one lane-dense (M, 3*dh) matmul)
    qkv = linear(x2, params["w_qkv"], params["b_qkv"]).reshape(N, T, 3 * dh)

    # scaled dot-product attention, non-causal, pad mask on keys
    attn = attention(qkv, pad_mask, n_heads=n_heads, d_k=d_k)       # (N, T, dh)

    # output projection + residual + LayerNorm1 (fused)
    x1 = proj_add_layernorm(attn.reshape(N * T, dh), params["wo"], params["bo"],
                            x2, params["ln1_g"], params["ln1_b"])

    # FFN + residual + LayerNorm2 (fused)
    # TODO(synk): nn.Dropout layers are identity here (eval mode).
    out = ffn_add_layernorm(x1, params["w1"], params["b1"],
                            params["w2"], params["b2"],
                            params["ln2_g"], params["ln2_b"])
    return out.reshape(N, T, D)


def init_params(key, d_model, d_k, n_heads):
    dh = d_k * n_heads
    ks = jax.random.split(key, 6)

    def dense(k, fan_in, fan_out):
        return 0.02 * jax.random.normal(k, (fan_in, fan_out), jnp.float32)

    wq, wk, wv = (dense(ks[0], d_model, dh), dense(ks[1], d_model, dh),
                  dense(ks[2], d_model, dh))
    return {
        # fused QKV projection: [ query | key | value ] along the output dim
        "w_qkv": jnp.concatenate([wq, wk, wv], axis=1),
        "b_qkv": jnp.zeros((3 * dh,), jnp.float32),
        "wo": dense(ks[3], dh, d_model), "bo": jnp.zeros((d_model,), jnp.float32),
        "w1": dense(ks[4], d_model, 4 * d_model),
        "b1": jnp.zeros((4 * d_model,), jnp.float32),
        "w2": dense(ks[5], 4 * d_model, d_model),
        "b2": jnp.zeros((d_model,), jnp.float32),
        "ln1_g": jnp.ones((d_model,), jnp.float32),
        "ln1_b": jnp.zeros((d_model,), jnp.float32),
        "ln2_g": jnp.ones((d_model,), jnp.float32),
        "ln2_b": jnp.zeros((d_model,), jnp.float32),
    }


if __name__ == "__main__":
    d_model, d_k, n_heads = 32, 8, 4
    N, T = 2, 8

    key = jax.random.PRNGKey(0)
    kp, kx = jax.random.split(key)

    params = init_params(kp, d_model, d_k, n_heads)
    x = jax.random.normal(kx, (N, T, d_model), jnp.float32)

    # pad mask: True = valid token, False = padding (applied to keys)
    lens = jnp.array([8, 6])
    pad_mask = jnp.arange(T)[None, :] < lens[:, None]

    out = encoder_block(params, x, pad_mask, n_heads=n_heads, d_k=d_k)
    out = jax.block_until_ready(out)
    assert out.shape == (N, T, d_model)
    assert bool(jnp.all(jnp.isfinite(out)))
    print("KERNEL_OK")
</pallas_src>

<mosaic_0001>
module attributes {stable_mosaic.version = 11 : i64} {
  func.func @_matmul_bias_kernel(%arg0: i32, %arg1: i32, %arg2: i32, %arg3: memref<16x32xf32, #tpu.memory_space<vmem>>, %arg4: memref<32x96xf32, #tpu.memory_space<vmem>>, %arg5: memref<1x96xf32, #tpu.memory_space<vmem>>, %arg6: memref<16x96xf32, #tpu.memory_space<vmem>>, %arg7: memref<16x96xf32, #tpu.memory_space<vmem>>) attributes {dimension_semantics = [#tpu.dimension_semantics<parallel>, #tpu.dimension_semantics<parallel>, #tpu.dimension_semantics<arbitrary>], iteration_bounds = array<i64: 1, 1, 1>, scalar_prefetch = 0 : i64, scratch_operands = 1 : i64, tpu.core_type = #tpu.core_type<tc>, window_params = [{transform_indices = @transform_0, window_bounds = array<i64: 16, 32>}, {transform_indices = @transform_1, window_bounds = array<i64: 32, 96>}, {transform_indices = @transform_2, window_bounds = array<i64: 1, 96>}, {transform_indices = @transform_3, window_bounds = array<i64: 16, 96>}]} {
    %c0_i32 = arith.constant 0 : i32
    %0 = arith.cmpi eq, %arg2, %c0_i32 : i32
    %1 = arith.extui %0 : i1 to i32
    %c0_i32_0 = arith.constant 0 : i32
    %2 = arith.cmpi ne, %1, %c0_i32_0 : i32
    scf.if %2 {
      %cst_10 = arith.constant 0.000000e+00 : f32
      %12 = vector.broadcast %cst_10 : f32 to vector<16x96xf32>
      %c0_11 = arith.constant 0 : index
      %c0_12 = arith.constant 0 : index
      %13 = vector.load %arg7[%c0_11, %c0_12] : memref<16x96xf32, #tpu.memory_space<vmem>>, vector<16x96xf32>
      tpu.vector_store %arg7[%c0_11, %c0_12], %12 {strides = array<i32>} : memref<16x96xf32, #tpu.memory_space<vmem>>, vector<16x96xf32>,
    } else {
    }
    %c0 = arith.constant 0 : index
    %c0_1 = arith.constant 0 : index
    %3 = vector.load %arg7[%c0, %c0_1] : memref<16x96xf32, #tpu.memory_space<vmem>>, vector<16x96xf32>
    %c0_2 = arith.constant 0 : index
    %c0_3 = arith.constant 0 : index
    %4 = vector.load %arg3[%c0_2, %c0_3] : memref<16x32xf32, #tpu.memory_space<vmem>>, vector<16x32xf32>
    %c0_4 = arith.constant 0 : index
    %c0_5 = arith.constant 0 : index
    %5 = vector.load %arg4[%c0_4, %c0_5] : memref<32x96xf32, #tpu.memory_space<vmem>>, vector<32x96xf32>
    %cst = arith.constant dense<0.000000e+00> : vector<16x96xf32>
    %6 = tpu.matmul %4, %5, %cst {dimension_numbers = #tpu.dot_dimension_numbers<[1], [0], [0], [1], [0, 0, 1, 1], [], []>} : vector<16x32xf32>, vector<32x96xf32>, vector<16x96xf32> -> vector<16x96xf32>
    %7 = arith.addf %3, %6 : vector<16x96xf32>
    %c0_6 = arith.constant 0 : index
    %c0_7 = arith.constant 0 : index
    %8 = vector.load %arg7[%c0_6, %c0_7] : memref<16x96xf32, #tpu.memory_space<vmem>>, vector<16x96xf32>
    tpu.vector_store %arg7[%c0_6, %c0_7], %7 {strides = array<i32>} : memref<16x96xf32, #tpu.memory_space<vmem>>, vector<16x96xf32>,
    %c0_i32_8 = arith.constant 0 : i32
    %9 = arith.cmpi eq, %arg2, %c0_i32_8 : i32
    %10 = arith.extui %9 : i1 to i32
    %c0_i32_9 = arith.constant 0 : i32
    %11 = arith.cmpi ne, %10, %c0_i32_9 : i32
    scf.if %11 {
      %c0_10 = arith.constant 0 : index
      %c0_11 = arith.constant 0 : index
      %12 = vector.load %arg7[%c0_10, %c0_11] : memref<16x96xf32, #tpu.memory_space<vmem>>, vector<16x96xf32>
      %c0_12 = arith.constant 0 : index
      %c0_13 = arith.constant 0 : index
      %13 = vector.load %arg5[%c0_12, %c0_13] : memref<1x96xf32, #tpu.memory_space<vmem>>, vector<1x96xf32>
      %14 = vector.broadcast %13 : vector<1x96xf32> to vector<16x96xf32>
      %15 = arith.addf %12, %14 : vector<16x96xf32>
      %c0_14 = arith.constant 0 : index
      %c0_15 = arith.constant 0 : index
      %16 = vector.load %arg6[%c0_14, %c0_15] : memref<16x96xf32, #tpu.memory_space<vmem>>, vector<16x96xf32>
      tpu.vector_store %arg6[%c0_14, %c0_15], %15 {strides = array<i32>} : memref<16x96xf32, #tpu.memory_space<vmem>>, vector<16x96xf32>,
    } else {
    }
    return
  }
  func.func @transform_0(%arg0: i32, %arg1: i32, %arg2: i32) -> (i32, i32) {
    %c0_i32 = arith.constant 0 : i32
    return %arg0, %arg2 : i32, i32
  }
  func.func @transform_1(%arg0: i32, %arg1: i32, %arg2: i32) -> (i32, i32) {
    %c0_i32 = arith.constant 0 : i32
    return %arg2, %arg1 : i32, i32
  }
  func.func @transform_2(%arg0: i32, %arg1: i32, %arg2: i32) -> (i32, i32) {
    %c0_i32 = arith.constant 0 : i32
    %c0_i32_0 = arith.constant 0 : i32
    return %c0_i32, %arg1 : i32, i32
  }
  func.func @transform_3(%arg0: i32, %arg1: i32, %arg2: i32) -> (i32, i32) {
    %c0_i32 = arith.constant 0 : i32
    return %arg0, %arg1 : i32, i32
  }
}

</mosaic_0001>

<bundles_post_ra>
// kernel: tpu_custom_call.1
= control target key start
LH: loop header
LB: loop body
LE: loop exit
PB: predicated region body
PF: predicated region fallthrough
CT: control target
= control target key end

     0   :  { %8 = vsyncpa [#allocation4], 0  ;;  %s365_s0 = inlined_call_operand.hbm [shape: f32[16,32], index: 0, kind: input, shape index: {}]   ;;  %s366_s1 = inlined_call_operand.hbm [shape: f32[32,96], index: 1, kind: input, shape index: {}]   ;;  %s367_s2 = inlined_call_operand.vmem [shape: f32[1,96], index: 2, kind: input, shape index: {}]   ;;  %s368_s3 = inlined_call_operand.hbm [shape: f32[16,96], index: 3, kind: output, shape index: {}]  }
   0x1   :  { %9 = vsyncpa [#allocation7], 0 }
   0x2   :  { %10 = vsyncpa [#allocation5], 0  ;;  %s285_s12 = smov [#allocation3]   ;;  %s213_s16 = scalar_lea.hbm %s365_s0, 256 }
   0x3   :  { %s16_s13 = sshll.u32 %s285_s12, 4  ;;  %p214_p0 = scmp.ne.s32.totalorder %s365_s0, %s213_s16  ;;  %s17_s13 = int_to_ptr.vmem [resolvable:$true] %s16_s13 }
   0x4   :  { %p217_p1 = scmp.lt.u32.totalorder %s213_s16, %s365_s0 }
   0x6   :  { %p219_p2 = pnand %p217_p1, %p214_p0 }
   0x8   :  { %222 = shalt.err (!%p219_p2)
}
   0x9   :  { %s223_s21 = scalar_lea.vmem %s17_s13, 256  ;;  %p228_p4 = scmp.lt.s32.totalorder %s17_s13, %s17_s13 }
   0xa   :  { %p224_p3 = scmp.ne.s32.totalorder %s17_s13, %s223_s21  ;;  %p229_p5 = scmp.lt.s32.totalorder %s223_s21, %s223_s21 }
   0xc   :  { %p230_p6 = por %p229_p5, %p228_p4 }
   0xe   :  { %p231_p7 = pnand %p230_p6, %p224_p3 }
  0x10   :  { %234 = shalt.err (!%p231_p7)
}
  0x11   :  { %s286_s22 = smov 128   ;;  %s287_s23 = smov 8  }
  0x12   :  { %22 = dma.hbm_to_vmem [thread:$0]  %s365_s0, 256, %s17_s13, [#allocation4], %s286_s22, %s286_s22, %s287_s23  }
  0x13   :  { %s288_s26 = smov [#allocation6]   ;;  %s235_s30 = scalar_lea.hbm %s366_s1, 512 }
  0x14   :  { %s28_s27 = sshll.u32 %s288_s26, 4  ;;  %p236_p8 = scmp.ne.s32.totalorder %s366_s1, %s235_s30  ;;  %s29_s27 = int_to_ptr.vmem [resolvable:$true] %s28_s27 }
  0x15   :  { %p239_p9 = scmp.lt.u32.totalorder %s235_s30, %s366_s1 }
  0x17   :  { %p241_p10 = pnand %p239_p9, %p236_p8 }
  0x19   :  { %244 = shalt.err (!%p241_p10)
}
  0x1a   :  { %s245_s8 = scalar_lea.vmem %s29_s27, 512  ;;  %p250_p12 = scmp.lt.s32.totalorder %s29_s27, %s29_s27 }
  0x1b   :  { %p246_p11 = scmp.ne.s32.totalorder %s29_s27, %s245_s8  ;;  %p251_p13 = scmp.lt.s32.totalorder %s245_s8, %s245_s8 }
  0x1d   :  { %p252_p0 = por %p251_p13, %p250_p12 }
  0x1f   :  { %p253_p1 = pnand %p252_p0, %p246_p11 }
  0x21   :  { %256 = shalt.err (!%p253_p1)
}
  0x22   :  { %34 = dma.hbm_to_vmem [thread:$0]  %s366_s1, 512, %s29_s27, [#allocation7], %s286_s22, %s286_s22, %s287_s23  }
  0x23   :  { %279 = dma.done.wait [#allocation4], 256  }
  0x24   :  { %280 = vsyncadd [#allocation4], 4294967040 }
  0x25   :  { %281 = dma.done.wait [#allocation7], 512  }
  0x26   :  { %282 = vsyncadd [#allocation7], 4294966784  ;;  %vm47_vm0 = vcmask 785408   ;;  %v289_v0 = vmov 0.0   ;;  %vm58_vm1 = vcmask 261120   ;;  %v54_v1 = vld [vmem:[#allocation6] sm:$0xff] }
  0x27   :  { %49 = vst.msk [vmem:[#allocation2 + $0x8] sm:$0xff] %vm47_vm0, %v289_v0  ;;  %48 = vst.msk [vmem:[#allocation2] sm:$0xff] %vm47_vm0, %v289_v0  ;;  %v55_v2 = vld [vmem:[#allocation6 + $0x8] sm:$0xff]  ;;  %v56_v3 = vld [vmem:[#allocation6 + $0x10] sm:$0xff]  ;;  %s290_s11 = smov [#allocation8]  }
  0x28   :  { %v199_v4 = vpack.c.bf16 %v55_v2, %v54_v1  ;;  %v57_v5 = vld [vmem:[#allocation6 + $0x18] sm:$0xff]  ;;  %v52_v6 = vld [vmem:[#allocation3] sm:$0xff]  ;;  %v181_v15 = vld [vmem:[%s367_s2] ss:$0 sm:$0xff]  ;;  %s166_s12 = sshll.u32 %s290_s11, 4  ;;  %s167_s12 = int_to_ptr.vmem [resolvable:$true] %s166_s12 }
  0x29   :  { %v203_v7 = vpack.c.bf16 %v57_v5, %v56_v3  ;;  %196 = vmatprep.mubr.msk.f32.mxu0 %vm58_vm1, %v52_v6  ;;  %v53_v8 = vld [vmem:[#allocation3 + $0x8] sm:$0xff]  ;;  %s257_s13 = scalar_lea.vmem %s167_s12, 256  ;;  %p262_p3 = scmp.lt.s32.totalorder %s167_s12, %s167_s12 }
  0x2a   :  { %200 = vmatprep.subr.bf16.mxu0 %v199_v4  ;;  %p258_p2 = scmp.ne.s32.totalorder %s167_s12, %s257_s13  ;;  %p263_p4 = scmp.lt.s32.totalorder %s257_s13, %s257_s13 }
  0x2b   :  { %202 = vmatpush3.bf16.msra.mxu0 %v199_v4 }
  0x2c   :  { %204 = vmatprep.subr.bf16.mxu0 %v203_v7  ;;  %p264_p5 = por %p263_p4, %p262_p3 }
  0x2e   :  { %v51_v9 = vld [vmem:[#allocation2 + $0x8] sm:$0xff]  ;;  %v50_v10 = vld [vmem:[#allocation2] sm:$0xff]  ;;  %p265_p6 = pnand %p264_p5, %p258_p2 }
  0x2f   :  { %206 = vmatpush3.bf16.msra.mxu0 %v203_v7 }
  0x32   :  { %197 = vmatmul.mubr.msk.f32.vlgmr.msra.gmra.mrb[0].mxu0 %vm58_vm1, %v53_v8 }
 0x105   :  { %v198_v11 = vpop.f32.mrb[0].mxu0 }
 0x106   :  { %v141_v12 = vadd.f32 %v198_v11, %v51_v9  ;;  %v131_v13 = vpop.f32.mrb[1].mxu0 }
 0x107   :  { %v140_v14 = vadd.f32 %v131_v13, %v50_v10 }
 0x108   :  { %144 = vst.msk [vmem:[#allocation2 + $0x8] sm:$0xff] %vm47_vm0, %v141_v12 }
 0x109   :  { %143 = vst.msk [vmem:[#allocation2] sm:$0xff] %vm47_vm0, %v140_v14 }
 0x10f   :  { %v149_v16 = vld [vmem:[#allocation2 + $0x8] sm:$0xff] }
 0x110   :  { %v148_v17 = vld [vmem:[#allocation2] sm:$0xff]  ;;  %v158_v18 = vadd.f32 %v181_v15, %v149_v16 }
 0x111   :  { %v157_v19 = vadd.f32 %v181_v15, %v148_v17 }
 0x112   :  { %160 = vst.msk [vmem:[#allocation8 + $0x8] sm:$0xff] %vm47_vm0, %v158_v18 }
 0x113   :  { %159 = vst.msk [vmem:[#allocation8] sm:$0xff] %vm47_vm0, %v157_v19 }
 0x114   :  { %268 = shalt.err (!%p265_p6)
}
 0x115   :  { %s269_s15 = scalar_lea.hbm %s368_s3, 256 }
 0x116   :  { %p270_p7 = scmp.ne.s32.totalorder %s368_s3, %s269_s15  ;;  %p273_p8 = scmp.lt.u32.totalorder %s269_s15, %s368_s3 }
 0x118   :  { %p275_p9 = pnand %p273_p8, %p270_p7 }
 0x11a   :  { %278 = shalt.err (!%p275_p9)
}
 0x11b   :  { %172 = dma.vmem_to_hbm [thread:$0]  %s167_s12, 256, %s368_s3, [#allocation5], %s286_s22, %s286_s22, %s287_s23  }
 0x11c   :  { %283 = dma.done.wait [#allocation5], 256  }
 0x11d   :  { %284 = vsyncadd [#allocation5], 4294967040 }
 0x11e   :  { %176 = vsyncpa [#allocation4], 1 }
 0x11f   :  { %177 = vsyncpa [#allocation7], 1 }
 0x120   :  { %178 = vsyncpa [#allocation5], 1 }

</bundles_post_ra>
